<compile_context>
chip_gen: v6e
topology: v6e:2x2x1
jax: 0.10.0
libtpu: 0.0.40
codegen_flags: <defaults>
</compile_context>

<pallas_src>
import functools

import jax
import jax.numpy as jnp
from jax.experimental import pallas as pl
from jax.experimental.pallas import tpu as pltpu

_SUBLANES = 8
_MIN_TILE = _SUBLANES * 128  # 1024 edges: (8 sublanes) x (128 lanes)


def _rbf_kernel(dist_ref, out_ref, *, cutoff, n_rbf):
    # dist_ref: (8, T) f32  -- edges on sublane+lane axes (fully dense)
    # out_ref : (n_rbf, 8, T) f32
    d = dist_ref[...]                                      # (8, T)
    base = jnp.pi / cutoff                                 # python float

    theta = d * base                                       # (8, T)
    c = jnp.cos(theta)                                     # (8, T)
    s1 = jnp.sin(theta)                                    # (8, T)
    two_c = 2.0 * c                                        # (8, T)

    is_zero = d == 0.0                                     # (8, T)
    denom = jnp.where(is_zero, 1.0, d)                     # (8, T)
    # exact reciprocal (approx=True would risk the 1e-5 tolerance); one recip
    # per edge, then n_rbf broadcast multiplies.
    inv = pl.reciprocal(denom, approx=False)               # (8, T)
    # Hoist the cutoff mask onto the per-edge factor: one select per edge
    # instead of n_rbf selects on the full (n_rbf, 8, T) result.
    inv = jnp.where(d >= cutoff, 0.0, inv)                 # (8, T)

    # sin(n*theta) via the Chebyshev recurrence  s_n = 2*cos(theta)*s_{n-1} - s_{n-2}
    # (static Python loop -> fully unrolled, row-by-row lane-dense stores).
    s_prev = jnp.zeros_like(d)                             # sin(0*theta)
    s_cur = s1                                             # sin(1*theta)
    for n in range(1, n_rbf + 1):
        # d == 0: numerator is the limit value coef = n*pi/cutoff (inv == 1 there).
        num = jnp.where(is_zero, n * base, s_cur)
        out_ref[n - 1, :, :] = num * inv
        s_next = two_c * s_cur - s_prev
        s_prev = s_cur
        s_cur = s_next


def painn_radial_basis(dist, n_rbf, cutoff, *, tile_e=32768):
    """Pallas implementation of PainnRadialBasis.forward.

    Args:
      dist: array of distances, any shape S, float32.
      n_rbf: number of radial basis functions.
      cutoff: cutoff radius (python float).
    Returns:
      array of shape S + (n_rbf,), float32.
    """
    dist = jnp.asarray(dist, jnp.float32)
    orig_shape = dist.shape
    flat = dist.reshape(-1)
    e = flat.shape[0]
    n_rbf = int(n_rbf)
    cutoff = float(cutoff)

    # Tile must be a multiple of 8*128 (sublane x lane). Cap it so that
    # (a) tiny problems don't over-pad, and (b) problems with >= ~2 tiles of
    # work get at least 2 grid steps (v7x has 2 TensorCores per chip and
    # "parallel" only helps with >= 2 steps).
    e_ceil = pl.cdiv(e, _MIN_TILE) * _MIN_TILE
    half = pl.cdiv(pl.cdiv(e_ceil, 2), _MIN_TILE) * _MIN_TILE
    tile_e = max(_MIN_TILE, min(int(tile_e), max(_MIN_TILE, half)))

    e_pad = pl.cdiv(e, tile_e) * tile_e
    if e_pad != e:
        # Padded entries are d=0 (produce finite coef values, sliced off below).
        flat = jnp.pad(flat, (0, e_pad - e))

    rows = e_pad // _SUBLANES
    d_slab = flat.reshape(_SUBLANES, rows)                 # edge j -> (j // rows, j % rows)
    t = tile_e // _SUBLANES                                # lane extent per block (mult of 128)
    grid = (e_pad // tile_e,)

    cost = pl.CostEstimate(
        flops=4 * n_rbf * e_pad,
        transcendentals=3 * e_pad,                         # sin + cos + reciprocal per edge
        bytes_accessed=4 * e_pad + 4 * n_rbf * e_pad,
    )

    out_3d = pl.pallas_call(
        functools.partial(_rbf_kernel, cutoff=cutoff, n_rbf=n_rbf),
        out_shape=jax.ShapeDtypeStruct((n_rbf, _SUBLANES, rows), jnp.float32),
        grid_spec=pltpu.PrefetchScalarGridSpec(
            num_scalar_prefetch=0,
            grid=grid,
            in_specs=[
                pl.BlockSpec((_SUBLANES, t), lambda i: (0, i)),          # distances
            ],
            out_specs=pl.BlockSpec((n_rbf, _SUBLANES, t), lambda i: (0, 0, i)),
        ),
        compiler_params=pltpu.CompilerParams(
            dimension_semantics=("parallel",),   # shard tiles across TCs on v7x
        ),
        cost_estimate=cost,
    )(d_slab)

    # Layout plumbing back to the module's S + (n_rbf,) convention.
    out = out_3d.reshape(n_rbf, e_pad)[:, :e].T
    return out.reshape(*orig_shape, n_rbf)


def _reference(dist, n_rbf, cutoff):
    dist = jnp.asarray(dist, jnp.float32)
    shape_d = dist[..., None]
    n = jnp.arange(1, n_rbf + 1, dtype=jnp.float32)
    coef = n * jnp.pi / cutoff
    denom = jnp.where(shape_d == 0, 1.0, shape_d)
    num = jnp.where(shape_d == 0, coef, jnp.sin(coef * shape_d))
    return jnp.where(shape_d >= cutoff, 0.0, num / denom)


if __name__ == "__main__":
    key = jax.random.PRNGKey(0)
    n_rbf = 20
    cutoff = 5.0

    # 1-D case: deliberately not a multiple of the tile width to exercise
    # padding; include exact zeros and an exactly-at-cutoff value to hit all
    # branches.
    n_edges = 50
    dist = jax.random.uniform(key, (n_edges,), dtype=jnp.float32, minval=0.0, maxval=7.0)
    dist = dist.at[0].set(0.0).at[1].set(cutoff).at[2].set(0.0)

    out = painn_radial_basis(dist, n_rbf, cutoff)
    out = jax.block_until_ready(out)
    ref = _reference(dist, n_rbf, cutoff)
    assert out.shape == (n_edges, n_rbf), out.shape
    assert jnp.allclose(out, ref, atol=1e-5, rtol=1e-5), float(jnp.max(jnp.abs(out - ref)))

    # 2-D case: checks the shape S + (n_rbf,) contract for non-flat inputs.
    key2 = jax.random.PRNGKey(1)
    dist2 = jax.random.uniform(key2, (3, 7), dtype=jnp.float32, minval=0.0, maxval=7.0)
    out2 = jax.block_until_ready(painn_radial_basis(dist2, n_rbf, cutoff))
    ref2 = _reference(dist2, n_rbf, cutoff)
    assert out2.shape == (3, 7, n_rbf), out2.shape
    assert jnp.allclose(out2, ref2, atol=1e-5, rtol=1e-5), float(jnp.max(jnp.abs(out2 - ref2)))

    print("KERNEL_OK")
</pallas_src>

<mosaic_0001>
module attributes {stable_mosaic.version = 11 : i64} {
  func.func @_rbf_kernel(%arg0: i32, %arg1: memref<8x128xf32, #tpu.memory_space<vmem>>, %arg2: memref<20x8x128xf32, #tpu.memory_space<vmem>>) attributes {dimension_semantics = [#tpu.dimension_semantics<parallel>], iteration_bounds = array<i64: 1>, scalar_prefetch = 0 : i64, scratch_operands = 0 : i64, tpu.core_type = #tpu.core_type<tc>, window_params = [{transform_indices = @transform_0, window_bounds = array<i64: 8, 128>}, {transform_indices = @transform_1, window_bounds = array<i64: 20, 8, 128>}]} {
    %c0 = arith.constant 0 : index
    %c0_0 = arith.constant 0 : index
    %0 = vector.load %arg1[%c0, %c0_0] : memref<8x128xf32, #tpu.memory_space<vmem>>, vector<8x128xf32>
    %cst = arith.constant 0.628318548 : f32
    %1 = vector.broadcast %cst : f32 to vector<8x128xf32>
    %2 = arith.mulf %0, %1 : vector<8x128xf32>
    %3 = math.cos %2 : vector<8x128xf32>
    %4 = math.sin %2 : vector<8x128xf32>
    %cst_1 = arith.constant 2.000000e+00 : f32
    %5 = vector.broadcast %cst_1 : f32 to vector<8x128xf32>
    %6 = arith.mulf %5, %3 : vector<8x128xf32>
    %cst_2 = arith.constant 0.000000e+00 : f32
    %7 = vector.broadcast %cst_2 : f32 to vector<8x128xf32>
    %8 = arith.cmpf oeq, %0, %7 : vector<8x128xf32>
    %cst_3 = arith.constant 1.000000e+00 : f32
    %9 = vector.broadcast %cst_3 : f32 to vector<8x128xf32>
    %10 = arith.select %8, %9, %0 : vector<8x128xi1>, vector<8x128xf32>
    %11 = tpu.reciprocal %10 : vector<8x128xf32> -> vector<8x128xf32>
    %cst_4 = arith.constant 5.000000e+00 : f32
    %12 = vector.broadcast %cst_4 : f32 to vector<8x128xf32>
    %13 = arith.cmpf oge, %0, %12 : vector<8x128xf32>
    %cst_5 = arith.constant 0.000000e+00 : f32
    %14 = vector.broadcast %cst_5 : f32 to vector<8x128xf32>
    %15 = arith.select %13, %14, %11 : vector<8x128xi1>, vector<8x128xf32>
    %cst_6 = arith.constant 0.000000e+00 : f32
    %16 = vector.broadcast %cst_6 : f32 to vector<8x128xf32>
    %cst_7 = arith.constant 0.628318548 : f32
    %17 = vector.broadcast %cst_7 : f32 to vector<8x128xf32>
    %18 = arith.select %8, %17, %4 : vector<8x128xi1>, vector<8x128xf32>
    %19 = arith.mulf %18, %15 : vector<8x128xf32>
    %c0_8 = arith.constant 0 : index
    %c0_9 = arith.constant 0 : index
    %c0_10 = arith.constant 0 : index
    %20 = vector.load %arg2[%c0_8, %c0_9, %c0_10] : memref<20x8x128xf32, #tpu.memory_space<vmem>>, vector<1x8x128xf32>
    %21 = vector.shape_cast %20 : vector<1x8x128xf32> to vector<8x128xf32>
    %22 = vector.shape_cast %19 : vector<8x128xf32> to vector<1x8x128xf32>
    tpu.vector_store %arg2[%c0_8, %c0_9, %c0_10], %22 {strides = array<i32>} : memref<20x8x128xf32, #tpu.memory_space<vmem>>, vector<1x8x128xf32>,
    %23 = arith.mulf %6, %4 : vector<8x128xf32>
    %24 = arith.subf %23, %16 : vector<8x128xf32>
    %cst_11 = arith.constant 1.2566371 : f32
    %25 = vector.broadcast %cst_11 : f32 to vector<8x128xf32>
    %26 = arith.select %8, %25, %24 : vector<8x128xi1>, vector<8x128xf32>
    %27 = arith.mulf %26, %15 : vector<8x128xf32>
    %c1 = arith.constant 1 : index
    %c0_12 = arith.constant 0 : index
    %c0_13 = arith.constant 0 : index
    %28 = vector.load %arg2[%c1, %c0_12, %c0_13] : memref<20x8x128xf32, #tpu.memory_space<vmem>>, vector<1x8x128xf32>
    %29 = vector.shape_cast %28 : vector<1x8x128xf32> to vector<8x128xf32>
    %30 = vector.shape_cast %27 : vector<8x128xf32> to vector<1x8x128xf32>
    tpu.vector_store %arg2[%c1, %c0_12, %c0_13], %30 {strides = array<i32>} : memref<20x8x128xf32, #tpu.memory_space<vmem>>, vector<1x8x128xf32>,
    %31 = arith.mulf %6, %24 : vector<8x128xf32>
    %32 = arith.subf %31, %4 : vector<8x128xf32>
    %cst_14 = arith.constant 1.88495564 : f32
    %33 = vector.broadcast %cst_14 : f32 to vector<8x128xf32>
    %34 = arith.select %8, %33, %32 : vector<8x128xi1>, vector<8x128xf32>
    %35 = arith.mulf %34, %15 : vector<8x128xf32>
    %c2 = arith.constant 2 : index
    %c0_15 = arith.constant 0 : index
    %c0_16 = arith.constant 0 : index
    %36 = vector.load %arg2[%c2, %c0_15, %c0_16] : memref<20x8x128xf32, #tpu.memory_space<vmem>>, vector<1x8x128xf32>
    %37 = vector.shape_cast %36 : vector<1x8x128xf32> to vector<8x128xf32>
    %38 = vector.shape_cast %35 : vector<8x128xf32> to vector<1x8x128xf32>
    tpu.vector_store %arg2[%c2, %c0_15, %c0_16], %38 {strides = array<i32>} : memref<20x8x128xf32, #tpu.memory_space<vmem>>, vector<1x8x128xf32>,
    %39 = arith.mulf %6, %32 : vector<8x128xf32>
    %40 = arith.subf %39, %24 : vector<8x128xf32>
    %cst_17 = arith.constant 2.51327419 : f32
    %41 = vector.broadcast %cst_17 : f32 to vector<8x128xf32>
    %42 = arith.select %8, %41, %40 : vector<8x128xi1>, vector<8x128xf32>
    %43 = arith.mulf %42, %15 : vector<8x128xf32>
    %c3 = arith.constant 3 : index
    %c0_18 = arith.constant 0 : index
    %c0_19 = arith.constant 0 : index
    %44 = vector.load %arg2[%c3, %c0_18, %c0_19] : memref<20x8x128xf32, #tpu.memory_space<vmem>>, vector<1x8x128xf32>
    %45 = vector.shape_cast %44 : vector<1x8x128xf32> to vector<8x128xf32>
    %46 = vector.shape_cast %43 : vector<8x128xf32> to vector<1x8x128xf32>
    tpu.vector_store %arg2[%c3, %c0_18, %c0_19], %46 {strides = array<i32>} : memref<20x8x128xf32, #tpu.memory_space<vmem>>, vector<1x8x128xf32>,
    %47 = arith.mulf %6, %40 : vector<8x128xf32>
    %48 = arith.subf %47, %32 : vector<8x128xf32>
    %cst_20 = arith.constant 3.14159274 : f32
    %49 = vector.broadcast %cst_20 : f32 to vector<8x128xf32>
    %50 = arith.select %8, %49, %48 : vector<8x128xi1>, vector<8x128xf32>
    %51 = arith.mulf %50, %15 : vector<8x128xf32>
    %c4 = arith.constant 4 : index
    %c0_21 = arith.constant 0 : index
    %c0_22 = arith.constant 0 : index
    %52 = vector.load %arg2[%c4, %c0_21, %c0_22] : memref<20x8x128xf32, #tpu.memory_space<vmem>>, vector<1x8x128xf32>
    %53 = vector.shape_cast %52 : vector<1x8x128xf32> to vector<8x128xf32>
    %54 = vector.shape_cast %51 : vector<8x128xf32> to vector<1x8x128xf32>
    tpu.vector_store %arg2[%c4, %c0_21, %c0_22], %54 {strides = array<i32>} : memref<20x8x128xf32, #tpu.memory_space<vmem>>, vector<1x8x128xf32>,
    %55 = arith.mulf %6, %48 : vector<8x128xf32>
    %56 = arith.subf %55, %40 : vector<8x128xf32>
    %cst_23 = arith.constant 3.76991129 : f32
    %57 = vector.broadcast %cst_23 : f32 to vector<8x128xf32>
    %58 = arith.select %8, %57, %56 : vector<8x128xi1>, vector<8x128xf32>
    %59 = arith.mulf %58, %15 : vector<8x128xf32>
    %c5 = arith.constant 5 : index
    %c0_24 = arith.constant 0 : index
    %c0_25 = arith.constant 0 : index
    %60 = vector.load %arg2[%c5, %c0_24, %c0_25] : memref<20x8x128xf32, #tpu.memory_space<vmem>>, vector<1x8x128xf32>
    %61 = vector.shape_cast %60 : vector<1x8x128xf32> to vector<8x128xf32>
    %62 = vector.shape_cast %59 : vector<8x128xf32> to vector<1x8x128xf32>
    tpu.vector_store %arg2[%c5, %c0_24, %c0_25], %62 {strides = array<i32>} : memref<20x8x128xf32, #tpu.memory_space<vmem>>, vector<1x8x128xf32>,
    %63 = arith.mulf %6, %56 : vector<8x128xf32>
    %64 = arith.subf %63, %48 : vector<8x128xf32>
    %cst_26 = arith.constant 4.3982296 : f32
    %65 = vector.broadcast %cst_26 : f32 to vector<8x128xf32>
    %66 = arith.select %8, %65, %64 : vector<8x128xi1>, vector<8x128xf32>
    %67 = arith.mulf %66, %15 : vector<8x128xf32>
    %c6 = arith.constant 6 : index
    %c0_27 = arith.constant 0 : index
    %c0_28 = arith.constant 0 : index
    %68 = vector.load %arg2[%c6, %c0_27, %c0_28] : memref<20x8x128xf32, #tpu.memory_space<vmem>>, vector<1x8x128xf32>
    %69 = vector.shape_cast %68 : vector<1x8x128xf32> to vector<8x128xf32>
    %70 = vector.shape_cast %67 : vector<8x128xf32> to vector<1x8x128xf32>
    tpu.vector_store %arg2[%c6, %c0_27, %c0_28], %70 {strides = array<i32>} : memref<20x8x128xf32, #tpu.memory_space<vmem>>, vector<1x8x128xf32>,
    %71 = arith.mulf %6, %64 : vector<8x128xf32>
    %72 = arith.subf %71, %56 : vector<8x128xf32>
    %cst_29 = arith.constant 5.02654839 : f32
    %73 = vector.broadcast %cst_29 : f32 to vector<8x128xf32>
    %74 = arith.select %8, %73, %72 : vector<8x128xi1>, vector<8x128xf32>
    %75 = arith.mulf %74, %15 : vector<8x128xf32>
    %c7 = arith.constant 7 : index
    %c0_30 = arith.constant 0 : index
    %c0_31 = arith.constant 0 : index
    %76 = vector.load %arg2[%c7, %c0_30, %c0_31] : memref<20x8x128xf32, #tpu.memory_space<vmem>>, vector<1x8x128xf32>
    %77 = vector.shape_cast %76 : vector<1x8x128xf32> to vector<8x128xf32>
    %78 = vector.shape_cast %75 : vector<8x128xf32> to vector<1x8x128xf32>
    tpu.vector_store %arg2[%c7, %c0_30, %c0_31], %78 {strides = array<i32>} : memref<20x8x128xf32, #tpu.memory_space<vmem>>, vector<1x8x128xf32>,
    %79 = arith.mulf %6, %72 : vector<8x128xf32>
    %80 = arith.subf %79, %64 : vector<8x128xf32>
    %cst_32 = arith.constant 5.6548667 : f32
    %81 = vector.broadcast %cst_32 : f32 to vector<8x128xf32>
    %82 = arith.select %8, %81, %80 : vector<8x128xi1>, vector<8x128xf32>
    %83 = arith.mulf %82, %15 : vector<8x128xf32>
    %c8 = arith.constant 8 : index
    %c0_33 = arith.constant 0 : index
    %c0_34 = arith.constant 0 : index
    %84 = vector.load %arg2[%c8, %c0_33, %c0_34] : memref<20x8x128xf32, #tpu.memory_space<vmem>>, vector<1x8x128xf32>
    %85 = vector.shape_cast %84 : vector<1x8x128xf32> to vector<8x128xf32>
    %86 = vector.shape_cast %83 : vector<8x128xf32> to vector<1x8x128xf32>
    tpu.vector_store %arg2[%c8, %c0_33, %c0_34], %86 {strides = array<i32>} : memref<20x8x128xf32, #tpu.memory_space<vmem>>, vector<1x8x128xf32>,
    %87 = arith.mulf %6, %80 : vector<8x128xf32>
    %88 = arith.subf %87, %72 : vector<8x128xf32>
    %cst_35 = arith.constant 6.28318548 : f32
    %89 = vector.broadcast %cst_35 : f32 to vector<8x128xf32>
    %90 = arith.select %8, %89, %88 : vector<8x128xi1>, vector<8x128xf32>
    %91 = arith.mulf %90, %15 : vector<8x128xf32>
    %c9 = arith.constant 9 : index
    %c0_36 = arith.constant 0 : index
    %c0_37 = arith.constant 0 : index
    %92 = vector.load %arg2[%c9, %c0_36, %c0_37] : memref<20x8x128xf32, #tpu.memory_space<vmem>>, vector<1x8x128xf32>
    %93 = vector.shape_cast %92 : vector<1x8x128xf32> to vector<8x128xf32>
    %94 = vector.shape_cast %91 : vector<8x128xf32> to vector<1x8x128xf32>
    tpu.vector_store %arg2[%c9, %c0_36, %c0_37], %94 {strides = array<i32>} : memref<20x8x128xf32, #tpu.memory_space<vmem>>, vector<1x8x128xf32>,
    %95 = arith.mulf %6, %88 : vector<8x128xf32>
    %96 = arith.subf %95, %80 : vector<8x128xf32>
    %cst_38 = arith.constant 6.91150379 : f32
    %97 = vector.broadcast %cst_38 : f32 to vector<8x128xf32>
    %98 = arith.select %8, %97, %96 : vector<8x128xi1>, vector<8x128xf32>
    %99 = arith.mulf %98, %15 : vector<8x128xf32>
    %c10 = arith.constant 10 : index
    %c0_39 = arith.constant 0 : index
    %c0_40 = arith.constant 0 : index
    %100 = vector.load %arg2[%c10, %c0_39, %c0_40] : memref<20x8x128xf32, #tpu.memory_space<vmem>>, vector<1x8x128xf32>
    %101 = vector.shape_cast %100 : vector<1x8x128xf32> to vector<8x128xf32>
    %102 = vector.shape_cast %99 : vector<8x128xf32> to vector<1x8x128xf32>
    tpu.vector_store %arg2[%c10, %c0_39, %c0_40], %102 {strides = array<i32>} : memref<20x8x128xf32, #tpu.memory_space<vmem>>, vector<1x8x128xf32>,
    %103 = arith.mulf %6, %96 : vector<8x128xf32>
    %104 = arith.subf %103, %88 : vector<8x128xf32>
    %cst_41 = arith.constant 7.53982257 : f32
    %105 = vector.broadcast %cst_41 : f32 to vector<8x128xf32>
    %106 = arith.select %8, %105, %104 : vector<8x128xi1>, vector<8x128xf32>
    %107 = arith.mulf %106, %15 : vector<8x128xf32>
    %c11 = arith.constant 11 : index
    %c0_42 = arith.constant 0 : index
    %c0_43 = arith.constant 0 : index
    %108 = vector.load %arg2[%c11, %c0_42, %c0_43] : memref<20x8x128xf32, #tpu.memory_space<vmem>>, vector<1x8x128xf32>
    %109 = vector.shape_cast %108 : vector<1x8x128xf32> to vector<8x128xf32>
    %110 = vector.shape_cast %107 : vector<8x128xf32> to vector<1x8x128xf32>
    tpu.vector_store %arg2[%c11, %c0_42, %c0_43], %110 {strides = array<i32>} : memref<20x8x128xf32, #tpu.memory_space<vmem>>, vector<1x8x128xf32>,
    %111 = arith.mulf %6, %104 : vector<8x128xf32>
    %112 = arith.subf %111, %96 : vector<8x128xf32>
    %cst_44 = arith.constant 8.16814136 : f32
    %113 = vector.broadcast %cst_44 : f32 to vector<8x128xf32>
    %114 = arith.select %8, %113, %112 : vector<8x128xi1>, vector<8x128xf32>
    %115 = arith.mulf %114, %15 : vector<8x128xf32>
    %c12 = arith.constant 12 : index
    %c0_45 = arith.constant 0 : index
    %c0_46 = arith.constant 0 : index
    %116 = vector.load %arg2[%c12, %c0_45, %c0_46] : memref<20x8x128xf32, #tpu.memory_space<vmem>>, vector<1x8x128xf32>
    %117 = vector.shape_cast %116 : vector<1x8x128xf32> to vector<8x128xf32>
    %118 = vector.shape_cast %115 : vector<8x128xf32> to vector<1x8x128xf32>
    tpu.vector_store %arg2[%c12, %c0_45, %c0_46], %118 {strides = array<i32>} : memref<20x8x128xf32, #tpu.memory_space<vmem>>, vector<1x8x128xf32>,
    %119 = arith.mulf %6, %112 : vector<8x128xf32>
    %120 = arith.subf %119, %104 : vector<8x128xf32>
    %cst_47 = arith.constant 8.7964592 : f32
    %121 = vector.broadcast %cst_47 : f32 to vector<8x128xf32>
    %122 = arith.select %8, %121, %120 : vector<8x128xi1>, vector<8x128xf32>
    %123 = arith.mulf %122, %15 : vector<8x128xf32>
    %c13 = arith.constant 13 : index
    %c0_48 = arith.constant 0 : index
    %c0_49 = arith.constant 0 : index
    %124 = vector.load %arg2[%c13, %c0_48, %c0_49] : memref<20x8x128xf32, #tpu.memory_space<vmem>>, vector<1x8x128xf32>
    %125 = vector.shape_cast %124 : vector<1x8x128xf32> to vector<8x128xf32>
    %126 = vector.shape_cast %123 : vector<8x128xf32> to vector<1x8x128xf32>
    tpu.vector_store %arg2[%c13, %c0_48, %c0_49], %126 {strides = array<i32>} : memref<20x8x128xf32, #tpu.memory_space<vmem>>, vector<1x8x128xf32>,
    %127 = arith.mulf %6, %120 : vector<8x128xf32>
    %128 = arith.subf %127, %112 : vector<8x128xf32>
    %cst_50 = arith.constant 9.42477798 : f32
    %129 = vector.broadcast %cst_50 : f32 to vector<8x128xf32>
    %130 = arith.select %8, %129, %128 : vector<8x128xi1>, vector<8x128xf32>
    %131 = arith.mulf %130, %15 : vector<8x128xf32>
    %c14 = arith.constant 14 : index
    %c0_51 = arith.constant 0 : index
    %c0_52 = arith.constant 0 : index
    %132 = vector.load %arg2[%c14, %c0_51, %c0_52] : memref<20x8x128xf32, #tpu.memory_space<vmem>>, vector<1x8x128xf32>
    %133 = vector.shape_cast %132 : vector<1x8x128xf32> to vector<8x128xf32>
    %134 = vector.shape_cast %131 : vector<8x128xf32> to vector<1x8x128xf32>
    tpu.vector_store %arg2[%c14, %c0_51, %c0_52], %134 {strides = array<i32>} : memref<20x8x128xf32, #tpu.memory_space<vmem>>, vector<1x8x128xf32>,
    %135 = arith.mulf %6, %128 : vector<8x128xf32>
    %136 = arith.subf %135, %120 : vector<8x128xf32>
    %cst_53 = arith.constant 10.0530968 : f32
    %137 = vector.broadcast %cst_53 : f32 to vector<8x128xf32>
    %138 = arith.select %8, %137, %136 : vector<8x128xi1>, vector<8x128xf32>
    %139 = arith.mulf %138, %15 : vector<8x128xf32>
    %c15 = arith.constant 15 : index
    %c0_54 = arith.constant 0 : index
    %c0_55 = arith.constant 0 : index
    %140 = vector.load %arg2[%c15, %c0_54, %c0_55] : memref<20x8x128xf32, #tpu.memory_space<vmem>>, vector<1x8x128xf32>
    %141 = vector.shape_cast %140 : vector<1x8x128xf32> to vector<8x128xf32>
    %142 = vector.shape_cast %139 : vector<8x128xf32> to vector<1x8x128xf32>
    tpu.vector_store %arg2[%c15, %c0_54, %c0_55], %142 {strides = array<i32>} : memref<20x8x128xf32, #tpu.memory_space<vmem>>, vector<1x8x128xf32>,
    %143 = arith.mulf %6, %136 : vector<8x128xf32>
    %144 = arith.subf %143, %128 : vector<8x128xf32>
    %cst_56 = arith.constant 10.6814146 : f32
    %145 = vector.broadcast %cst_56 : f32 to vector<8x128xf32>
    %146 = arith.select %8, %145, %144 : vector<8x128xi1>, vector<8x128xf32>
    %147 = arith.mulf %146, %15 : vector<8x128xf32>
    %c16 = arith.constant 16 : index
    %c0_57 = arith.constant 0 : index
    %c0_58 = arith.constant 0 : index
    %148 = vector.load %arg2[%c16, %c0_57, %c0_58] : memref<20x8x128xf32, #tpu.memory_space<vmem>>, vector<1x8x128xf32>
    %149 = vector.shape_cast %148 : vector<1x8x128xf32> to vector<8x128xf32>
    %150 = vector.shape_cast %147 : vector<8x128xf32> to vector<1x8x128xf32>
    tpu.vector_store %arg2[%c16, %c0_57, %c0_58], %150 {strides = array<i32>} : memref<20x8x128xf32, #tpu.memory_space<vmem>>, vector<1x8x128xf32>,
    %151 = arith.mulf %6, %144 : vector<8x128xf32>
    %152 = arith.subf %151, %136 : vector<8x128xf32>
    %cst_59 = arith.constant 11.3097334 : f32
    %153 = vector.broadcast %cst_59 : f32 to vector<8x128xf32>
    %154 = arith.select %8, %153, %152 : vector<8x128xi1>, vector<8x128xf32>
    %155 = arith.mulf %154, %15 : vector<8x128xf32>
    %c17 = arith.constant 17 : index
    %c0_60 = arith.constant 0 : index
    %c0_61 = arith.constant 0 : index
    %156 = vector.load %arg2[%c17, %c0_60, %c0_61] : memref<20x8x128xf32, #tpu.memory_space<vmem>>, vector<1x8x128xf32>
    %157 = vector.shape_cast %156 : vector<1x8x128xf32> to vector<8x128xf32>
    %158 = vector.shape_cast %155 : vector<8x128xf32> to vector<1x8x128xf32>
    tpu.vector_store %arg2[%c17, %c0_60, %c0_61], %158 {strides = array<i32>} : memref<20x8x128xf32, #tpu.memory_space<vmem>>, vector<1x8x128xf32>,
    %159 = arith.mulf %6, %152 : vector<8x128xf32>
    %160 = arith.subf %159, %144 : vector<8x128xf32>
    %cst_62 = arith.constant 11.9380522 : f32
    %161 = vector.broadcast %cst_62 : f32 to vector<8x128xf32>
    %162 = arith.select %8, %161, %160 : vector<8x128xi1>, vector<8x128xf32>
    %163 = arith.mulf %162, %15 : vector<8x128xf32>
    %c18 = arith.constant 18 : index
    %c0_63 = arith.constant 0 : index
    %c0_64 = arith.constant 0 : index
    %164 = vector.load %arg2[%c18, %c0_63, %c0_64] : memref<20x8x128xf32, #tpu.memory_space<vmem>>, vector<1x8x128xf32>
    %165 = vector.shape_cast %164 : vector<1x8x128xf32> to vector<8x128xf32>
    %166 = vector.shape_cast %163 : vector<8x128xf32> to vector<1x8x128xf32>
    tpu.vector_store %arg2[%c18, %c0_63, %c0_64], %166 {strides = array<i32>} : memref<20x8x128xf32, #tpu.memory_space<vmem>>, vector<1x8x128xf32>,
    %167 = arith.mulf %6, %160 : vector<8x128xf32>
    %168 = arith.subf %167, %152 : vector<8x128xf32>
    %cst_65 = arith.constant 12.566371 : f32
    %169 = vector.broadcast %cst_65 : f32 to vector<8x128xf32>
    %170 = arith.select %8, %169, %168 : vector<8x128xi1>, vector<8x128xf32>
    %171 = arith.mulf %170, %15 : vector<8x128xf32>
    %c19 = arith.constant 19 : index
    %c0_66 = arith.constant 0 : index
    %c0_67 = arith.constant 0 : index
    %172 = vector.load %arg2[%c19, %c0_66, %c0_67] : memref<20x8x128xf32, #tpu.memory_space<vmem>>, vector<1x8x128xf32>
    %173 = vector.shape_cast %172 : vector<1x8x128xf32> to vector<8x128xf32>
    %174 = vector.shape_cast %171 : vector<8x128xf32> to vector<1x8x128xf32>
    tpu.vector_store %arg2[%c19, %c0_66, %c0_67], %174 {strides = array<i32>} : memref<20x8x128xf32, #tpu.memory_space<vmem>>, vector<1x8x128xf32>,
    return
  }
  func.func @transform_0(%arg0: i32) -> (i32, i32) {
    %c0_i32 = arith.constant 0 : i32
    %c0_i32_0 = arith.constant 0 : i32
    return %c0_i32, %arg0 : i32, i32
  }
  func.func @transform_1(%arg0: i32) -> (i32, i32, i32) {
    %c0_i32 = arith.constant 0 : i32
    %c0_i32_0 = arith.constant 0 : i32
    %c0_i32_1 = arith.constant 0 : i32
    return %c0_i32, %c0_i32_0, %arg0 : i32, i32, i32
  }
}

</mosaic_0001>

<bundles_post_ra>
// kernel: tpu_custom_call.1
= control target key start
LH: loop header
LB: loop body
LE: loop exit
PB: predicated region body
PF: predicated region fallthrough
CT: control target
= control target key end

     0   :  { %6 = vsyncpa [#allocation3], 0  ;;  %s579_s0 = inlined_call_operand.hbm [shape: f32[8,128], index: 0, kind: input, shape index: {}]   ;;  %s580_s1 = inlined_call_operand.hbm [shape: f32[20,8,128], index: 1, kind: output, shape index: {}]  }
   0x1   :  { %7 = vsyncpa [#allocation4], 0  ;;  %s441_s6 = smov [#allocation2]  }
   0x2   :  { %s14_s7 = sshll.u32 %s441_s6, 4  ;;  %s15_s7 = int_to_ptr.vmem [resolvable:$true] %s14_s7 }
   0x3   :  { %s405_s8 = scalar_lea.vmem %s15_s7, 128  ;;  %p410_p1 = scmp.lt.s32.totalorder %s15_s7, %s15_s7 }
   0x4   :  { %p406_p0 = scmp.ne.s32.totalorder %s15_s7, %s405_s8  ;;  %p411_p2 = scmp.lt.s32.totalorder %s405_s8, %s405_s8 }
   0x6   :  { %p412_p3 = por %p411_p2, %p410_p1 }
   0x8   :  { %p413_p4 = pnand %p412_p3, %p406_p0 }
   0xa   :  { %416 = shalt.err (!%p413_p4)
}
   0xb   :  { %17 = dma.hbm_to_vmem [thread:$0]  %s579_s0, 128, %s15_s7, [#allocation3]  }
   0xc   :  { %437 = dma.done.wait [#allocation3], 128  }
   0xd   :  { %438 = vsyncadd [#allocation3], 4294967168  ;;  %v464_v0 = vld [vmem:[#allocation2] sm:$0xff]  ;;  %v442_v13 = vmov 683565275   ;;  %s448_s0 = smov [#allocation5]  }
   0xe   :  { %v467_v1 = vmul.f32 0.62831855, %v464_v0  ;;  %v443_v15 = vmov 2475754826   ;;  %v444_v17 = vmov 2131351028  }
   0xf   :  { %v445_v19 = vmov 2102212464   ;;  %v446_v21 = vmov 920167782   ;;  %v447_v28 = vmov 1326507024  }
  0x10   :  { %v26_v2 = vand.u32 2139095040, %v467_v1  ;;  %v23_v4 = vand.u32 2147483647, %v467_v1  ;;  %vm25_vm7 = vcmp.lt.s32.totalorder %v467_v1, 0  ;;  %vm231_vm9 = vcmp.eq.f32.partialorder %v464_v0, 0.0  ;;  %s357_s11 = sshll.u32 %s448_s0, 4  ;;  %s358_s11 = int_to_ptr.vmem [resolvable:$true] %s357_s11 }
  0x11   :  { %s417_s12 = scalar_lea.vmem %s358_s11, 2560  ;;  %p422_p6 = scmp.lt.s32.totalorder %s358_s11, %s358_s11 }
  0x12   :  { %v27_v3 = vshrl.u32 %v26_v2, 23  ;;  %v30_v7 = vand.u32 8388607, %v23_v4  ;;  %vm24_vm8 = vcmp.le.f32.partialorder %v23_v4, 0.7853982  ;;  %p418_p5 = scmp.ne.s32.totalorder %s358_s11, %s417_s12  ;;  %p423_p7 = scmp.lt.s32.totalorder %s417_s12, %s417_s12 }
  0x14   :  { %v369_v5 = vadd.s32 4294967169, %v27_v3  ;;  %v31_v10 = vor.u32 8388608, %v30_v7  ;;  %p424_p8 = por %p423_p7, %p422_p6 }
  0x16   :  { %v33_v6 = vadd.s32 1, %v369_v5  ;;  %v71_v30 = vshll.u32 %v31_v10, 8  ;;  %p425_p9 = pnand %p424_p8, %p418_p5 }
  0x18   :  { %vm34_vm0 = vcmp.gt.s32.totalorder %v33_v6, 0 }
  0x19   :  { %v35_v8 = vsel %vm34_vm0, %v33_v6, 0  ;;  %vm234_vm0 = vcmp.ge.f32.partialorder %v464_v0, 5.0 }
  0x1a   :  { %v37_v9 = vand.u32 31, %v35_v8  ;;  %v36_v11 = vshrl.u32 %v35_v8, 5 }
  0x1c   :  { %v38_v12 = vsub.s32 32, %v37_v9  ;;  %v40_v14 = vshll.u32 %v442_v13, %v37_v9  ;;  %v43_v16 = vshll.u32 %v443_v15, %v37_v9  ;;  %v46_v18 = vshll.u32 %v444_v17, %v37_v9 }
  0x1d   :  { %v49_v20 = vshll.u32 %v445_v19, %v37_v9  ;;  %v52_v22 = vshll.u32 %v446_v21, %v37_v9  ;;  %vm55_vm1 = vcmp.lt.s32.totalorder %v36_v11, 1  ;;  %vm58_vm2 = vcmp.lt.s32.totalorder %v36_v11, 4 }
  0x1e   :  { %v39_v23 = vshrl.u32 %v442_v13, %v38_v12  ;;  %v41_v24 = vshrl.u32 %v443_v15, %v38_v12  ;;  %v44_v25 = vshrl.u32 %v444_v17, %v38_v12  ;;  %v47_v26 = vshrl.u32 %v445_v19, %v38_v12 }
  0x1f   :  { %v50_v27 = vshrl.u32 %v446_v21, %v38_v12  ;;  %v53_v29 = vshrl.u32 %v447_v28, %v38_v12  ;;  %vm56_vm3 = vcmp.lt.s32.totalorder %v36_v11, 2  ;;  %vm57_vm4 = vcmp.lt.s32.totalorder %v36_v11, 3 }
  0x20   :  { %v42_v31 = vor.u32 %v41_v24, %v40_v14  ;;  %v45_v32 = vor.u32 %v44_v25, %v43_v16  ;;  %v48_v33 = vor.u32 %v47_v26, %v46_v18  ;;  %v232_v21 = vsel %vm231_vm9, 1.0, %v464_v0 }
  0x21   :  { %v51_v34 = vor.u32 %v50_v27, %v49_v20  ;;  %v54_v35 = vor.u32 %v53_v29, %v52_v22 }
  0x22   :  { %v59_v36 = vsel %vm55_vm1, %v39_v23, %v42_v31  ;;  %v60_v37 = vsel %vm58_vm2, %v48_v33, 2102212464  ;;  %v63_v38 = vsel %vm55_vm1, %v42_v31, %v45_v32  ;;  %v67_v39 = vsel %vm55_vm1, %v45_v32, %v48_v33 }
  0x23   :  { %v61_v40 = vsel %vm57_vm4, %v45_v32, %v60_v37  ;;  %v64_v41 = vsel %vm58_vm2, %v51_v34, 920167782  ;;  %v68_v42 = vsel %vm58_vm2, %v54_v35, 1326507024  ;;  %vm115_vm1 = vweird.f32 %v467_v1 }
  0x24   :  { %v65_v43 = vsel %vm57_vm4, %v48_v33, %v64_v41  ;;  %v69_v44 = vsel %vm57_vm4, %v51_v34, %v68_v42  ;;  %v62_v45 = vsel %vm56_vm3, %v59_v36, %v61_v40 }
  0x25   :  { %v66_v46 = vsel %vm56_vm3, %v63_v38, %v65_v43  ;;  %v70_v47 = vsel %vm56_vm3, %v67_v39, %v69_v44  ;;  %v78_v52 = vmul.u32 %v71_v30, %v62_v45 }
  0x26   :  { %v473_v48 = vmul.u32.u64.low %v71_v30, %v70_v47  ;;  %v474_v49 = vmul.u32.u64.high %v71_v30, %v70_v47, %v473_v48  ;;  %v476_v50 = vmul.u32.u64.low %v71_v30, %v66_v46  ;;  %v477_v51 = vmul.u32.u64.high %v71_v30, %v66_v46, %v476_v50 }
  0x28   :  { %vm80_vm5 = vc.u32 %v474_v49, %v476_v50  ;;  %v81_v53 = vadd.s32 1, %v477_v51  ;;  %v79_v2 = vadd.s32 %v476_v50, %v474_v49 }
  0x2a   :  { %v82_v54 = vsel %vm80_vm5, %v81_v53, %v477_v51 }
  0x2b   :  { %v83_v55 = vadd.s32 %v82_v54, %v78_v52 }
  0x2d   :  { %v84_v56 = vadd.s32 536870912, %v83_v55 }
  0x2f   :  { %v85_v57 = vshrl.u32 %v84_v56, 30 }
  0x31   :  { %v86_v58 = vshll.u32 %v85_v57, 30  ;;  %v109_v16 = vsub.s32 4, %v85_v57 }
  0x33   :  { %v87_v59 = vsub.s32 %v83_v55, %v86_v58  ;;  %v110_v19 = vsel %vm25_vm7, %v109_v16, %v85_v57 }
  0x34   :  { %v112_v22 = vsel %vm24_vm8, 0, %v110_v19 }
  0x35   :  { %v89_v60 = vsub.s32 0, %v87_v59  ;;  %v219_v23 = vadd.s32 3, %v112_v22  ;;  %v116_v24 = vand.u32 3, %v112_v22 }
  0x37   :  { %v370_v61 = vmin.u32 %v89_v60, %v87_v59  ;;  %v220_v25 = vand.u32 3, %v219_v23  ;;  %vm121_vm10 = vcmp.eq.s32.totalorder %v116_v24, 2  ;;  %vm118_vm12 = vcmp.eq.s32.totalorder %v116_v24, 0 }
  0x38   :  { %vm117_vm14 = vcmp.lt.s32.totalorder %v116_v24, 2 }
  0x39   :  { %v91_v62 = vclz %v370_v61  ;;  %vm225_vm11 = vcmp.eq.s32.totalorder %v220_v25, 2  ;;  %vm222_vm13 = vcmp.eq.s32.totalorder %v220_v25, 0  ;;  %vm221_vm15 = vcmp.lt.s32.totalorder %v220_v25, 2 }
  0x3b   :  { %v371_v63 = vadd.s32 4294967294, %v91_v62 }
  0x3d   :  { %vm372_vm6 = vcmp.lt.s32.totalorder %v371_v63, 0 }
  0x3e   :  { %v94_v3 = vsel %vm372_vm6, 0, %v371_v63 }
  0x3f   :  { %v95_v5 = vsub.s32 32, %v94_v3  ;;  %v96_v6 = vshll.u32 %v87_v59, %v94_v3  ;;  %v99_v7 = vsub.s32 4294967266, %v94_v3 }
  0x41   :  { %v97_v8 = vshrl.u32 %v79_v2, %v95_v5  ;;  %v100_v9 = vadd.s32 127, %v99_v7 }
  0x43   :  { %v98_v10 = vor.u32 %v97_v8, %v96_v6  ;;  %v101_v11 = vshll.u32 %v100_v9, 23 }
  0x45   :  { %v102_v12 = vor.u32 4788187, %v101_v11  ;;  %v105_v13 = vcvt.s32.f32 %v98_v10 }
  0x47   :  { %v103_v14 = vand.u32 2147483647, %v102_v12 }
  0x49   :  { %v106_v15 = vmul.f32 %v105_v13, %v103_v14 }
  0x4b   :  { %v107_v17 = vxor.u32 2147483648, %v106_v15 }
  0x4d   :  { %v108_v18 = vsel %vm25_vm7, %v107_v17, %v106_v15 }
  0x4e   :  { %v111_v20 = vsel %vm24_vm8, %v467_v1, %v108_v18 }
  0x4f   :  { %391 = vcosq.f32 %v111_v20 }
  0x50   :  { %393 = vsinq.f32 %v111_v20 }
  0x51   :  { %395 = vrcp.f32 %v232_v21 }
  0x5c   :  { %v392_v26 = vpop.eup %391 }
  0x5d   :  { %v394_v4 = vpop.eup %393  ;;  %v122_v27 = vxor.u32 2147483648, %v392_v26 }
  0x5e   :  { %v396_v28 = vpop.eup %395  ;;  %v119_v29 = vxor.u32 2147483648, %v394_v4 }
  0x5f   :  { %v123_v30 = vsel %vm121_vm10, %v122_v27, %v394_v4  ;;  %v227_v31 = vsel %vm225_vm11, %v122_v27, %v394_v4  ;;  %v493_v36 = vsel %vm234_vm0, 0.0, %v396_v28 }
  0x60   :  { %v120_v32 = vsel %vm118_vm12, %v392_v26, %v119_v29  ;;  %v224_v33 = vsel %vm222_vm13, %v392_v26, %v119_v29 }
  0x61   :  { %v124_v34 = vsel %vm117_vm14, %v120_v32, %v123_v30  ;;  %v228_v35 = vsel %vm221_vm15, %v224_v33, %v227_v31 }
  0x62   :  { %v125_v37 = vsel %vm115_vm1, nan, %v124_v34  ;;  %v229_v38 = vsel %vm115_vm1, nan, %v228_v35 }
  0x63   :  { %v495_v39 = vmul.f32 2.0, %v125_v37  ;;  %v236_v40 = vsel %vm231_vm9, 0.62831855, %v229_v38 }
  0x64   :  { %v237_v41 = vmul.f32 %v236_v40, %v493_v36 }
  0x65   :  { %v239_v42 = vmul.f32 %v495_v39, %v229_v38 }
  0x66   :  { %238 = vst [vmem:[#allocation5] sm:$0xff] %v237_v41 }
  0x67   :  { %v240_v1 = vsel %vm231_vm9, 1.2566371, %v239_v42  ;;  %v244_v43 = vmul.f32 %v239_v42, %v495_v39 }
  0x68   :  { %v241_v44 = vmul.f32 %v240_v1, %v493_v36 }
  0x69   :  { %v245_v45 = vsub.f32 %v244_v43, %v229_v38 }
  0x6a   :  { %243 = vst [vmem:[#allocation5 + $0x8] sm:$0xff] %v241_v44 }
  0x6b   :  { %v246_v46 = vsel %vm231_vm9, 1.8849556, %v245_v45  ;;  %v250_v47 = vmul.f32 %v245_v45, %v495_v39 }
  0x6c   :  { %v247_v48 = vmul.f32 %v246_v46, %v493_v36 }
  0x6d   :  { %v251_v49 = vsub.f32 %v250_v47, %v239_v42 }
  0x6e   :  { %249 = vst [vmem:[#allocation5 + $0x10] sm:$0xff] %v247_v48 }
  0x6f   :  { %v252_v50 = vsel %vm231_vm9, 2.5132742, %v251_v49  ;;  %v256_v51 = vmul.f32 %v251_v49, %v495_v39 }
  0x70   :  { %v253_v52 = vmul.f32 %v252_v50, %v493_v36 }
  0x71   :  { %v257_v53 = vsub.f32 %v256_v51, %v245_v45 }
  0x72   :  { %255 = vst [vmem:[#allocation5 + $0x18] sm:$0xff] %v253_v52 }
  0x73   :  { %v258_v54 = vsel %vm231_vm9, 3.1415927, %v257_v53  ;;  %v262_v55 = vmul.f32 %v257_v53, %v495_v39 }
  0x74   :  { %v259_v56 = vmul.f32 %v258_v54, %v493_v36 }
  0x75   :  { %v263_v57 = vsub.f32 %v262_v55, %v251_v49 }
  0x76   :  { %261 = vst [vmem:[#allocation5 + $0x20] sm:$0xff] %v259_v56 }
  0x77   :  { %v264_v58 = vsel %vm231_vm9, 3.7699113, %v263_v57  ;;  %v268_v59 = vmul.f32 %v263_v57, %v495_v39 }
  0x78   :  { %v265_v60 = vmul.f32 %v264_v58, %v493_v36 }
  0x79   :  { %v269_v61 = vsub.f32 %v268_v59, %v257_v53 }
  0x7a   :  { %267 = vst [vmem:[#allocation5 + $0x28] sm:$0xff] %v265_v60 }
  0x7b   :  { %v270_v62 = vsel %vm231_vm9, 4.3982296, %v269_v61  ;;  %v274_v63 = vmul.f32 %v269_v61, %v495_v39 }
  0x7c   :  { %v271_v2 = vmul.f32 %v270_v62, %v493_v36 }
  0x7d   :  { %v275_v3 = vsub.f32 %v274_v63, %v263_v57 }
  0x7e   :  { %273 = vst [vmem:[#allocation5 + $0x30] sm:$0xff] %v271_v2 }
  0x7f   :  { %v276_v5 = vsel %vm231_vm9, 5.0265484, %v275_v3  ;;  %v280_v6 = vmul.f32 %v275_v3, %v495_v39 }
  0x80   :  { %v277_v7 = vmul.f32 %v276_v5, %v493_v36 }
  0x81   :  { %v281_v8 = vsub.f32 %v280_v6, %v269_v61 }
  0x82   :  { %279 = vst [vmem:[#allocation5 + $0x38] sm:$0xff] %v277_v7 }
  0x83   :  { %v282_v9 = vsel %vm231_vm9, 5.6548667, %v281_v8  ;;  %v286_v10 = vmul.f32 %v281_v8, %v495_v39 }
  0x84   :  { %v283_v11 = vmul.f32 %v282_v9, %v493_v36 }
  0x85   :  { %v287_v12 = vsub.f32 %v286_v10, %v275_v3 }
  0x86   :  { %285 = vst [vmem:[#allocation5 + $0x40] sm:$0xff] %v283_v11 }
  0x87   :  { %v288_v13 = vsel %vm231_vm9, 6.2831855, %v287_v12  ;;  %v292_v14 = vmul.f32 %v287_v12, %v495_v39 }
  0x88   :  { %v289_v15 = vmul.f32 %v288_v13, %v493_v36 }
  0x89   :  { %v293_v16 = vsub.f32 %v292_v14, %v281_v8 }
  0x8a   :  { %291 = vst [vmem:[#allocation5 + $0x48] sm:$0xff] %v289_v15 }
  0x8b   :  { %v294_v17 = vsel %vm231_vm9, 6.911504, %v293_v16  ;;  %v298_v18 = vmul.f32 %v293_v16, %v495_v39 }
  0x8c   :  { %v295_v19 = vmul.f32 %v294_v17, %v493_v36 }
  0x8d   :  { %v299_v20 = vsub.f32 %v298_v18, %v287_v12 }
  0x8e   :  { %297 = vst [vmem:[#allocation5 + $0x50] sm:$0xff] %v295_v19 }
  0x8f   :  { %v300_v21 = vsel %vm231_vm9, 7.5398226, %v299_v20  ;;  %v304_v22 = vmul.f32 %v299_v20, %v495_v39 }
  0x90   :  { %v301_v23 = vmul.f32 %v300_v21, %v493_v36 }
  0x91   :  { %v305_v24 = vsub.f32 %v304_v22, %v293_v16 }
  0x92   :  { %303 = vst [vmem:[#allocation5 + $0x58] sm:$0xff] %v301_v23 }
  0x93   :  { %v306_v25 = vsel %vm231_vm9, 8.168141, %v305_v24  ;;  %v310_v26 = vmul.f32 %v305_v24, %v495_v39 }
  0x94   :  { %v307_v4 = vmul.f32 %v306_v25, %v493_v36 }
  0x95   :  { %v311_v27 = vsub.f32 %v310_v26, %v299_v20 }
  0x96   :  { %309 = vst [vmem:[#allocation5 + $0x60] sm:$0xff] %v307_v4 }
  0x97   :  { %v312_v28 = vsel %vm231_vm9, 8.796459, %v311_v27  ;;  %v316_v29 = vmul.f32 %v311_v27, %v495_v39 }
  0x98   :  { %v313_v30 = vmul.f32 %v312_v28, %v493_v36 }
  0x99   :  { %v317_v31 = vsub.f32 %v316_v29, %v305_v24 }
  0x9a   :  { %315 = vst [vmem:[#allocation5 + $0x68] sm:$0xff] %v313_v30 }
  0x9b   :  { %v318_v32 = vsel %vm231_vm9, 9.424778, %v317_v31  ;;  %v322_v33 = vmul.f32 %v317_v31, %v495_v39 }
  0x9c   :  { %v319_v34 = vmul.f32 %v318_v32, %v493_v36 }
  0x9d   :  { %v323_v35 = vsub.f32 %v322_v33, %v311_v27 }
  0x9e   :  { %321 = vst [vmem:[#allocation5 + $0x70] sm:$0xff] %v319_v34 }
  0x9f   :  { %v324_v37 = vsel %vm231_vm9, 10.053097, %v323_v35  ;;  %v328_v38 = vmul.f32 %v323_v35, %v495_v39 }
  0xa0   :  { %v325_v40 = vmul.f32 %v324_v37, %v493_v36 }
  0xa1   :  { %v329_v41 = vsub.f32 %v328_v38, %v317_v31 }
  0xa2   :  { %327 = vst [vmem:[#allocation5 + $0x78] sm:$0xff] %v325_v40 }
  0xa3   :  { %v330_v42 = vsel %vm231_vm9, 10.681415, %v329_v41  ;;  %v334_v1 = vmul.f32 %v329_v41, %v495_v39 }
  0xa4   :  { %v331_v43 = vmul.f32 %v330_v42, %v493_v36 }
  0xa5   :  { %v335_v44 = vsub.f32 %v334_v1, %v323_v35 }
  0xa6   :  { %333 = vst [vmem:[#allocation5 + $0x80] sm:$0xff] %v331_v43 }
  0xa7   :  { %v336_v45 = vsel %vm231_vm9, 11.309733, %v335_v44  ;;  %v340_v46 = vmul.f32 %v335_v44, %v495_v39 }
  0xa8   :  { %v337_v47 = vmul.f32 %v336_v45, %v493_v36 }
  0xa9   :  { %v341_v48 = vsub.f32 %v340_v46, %v329_v41 }
  0xaa   :  { %339 = vst [vmem:[#allocation5 + $0x88] sm:$0xff] %v337_v47 }
  0xab   :  { %v342_v49 = vsel %vm231_vm9, 11.938052, %v341_v48  ;;  %v346_v50 = vmul.f32 %v341_v48, %v495_v39 }
  0xac   :  { %v343_v51 = vmul.f32 %v342_v49, %v493_v36 }
  0xad   :  { %v347_v52 = vsub.f32 %v346_v50, %v335_v44 }
  0xae   :  { %345 = vst [vmem:[#allocation5 + $0x90] sm:$0xff] %v343_v51 }
  0xaf   :  { %v348_v53 = vsel %vm231_vm9, 12.566371, %v347_v52 }
  0xb0   :  { %v349_v54 = vmul.f32 %v348_v53, %v493_v36 }
  0xb2   :  { %351 = vst [vmem:[#allocation5 + $0x98] sm:$0xff] %v349_v54 }
  0xb3   :  { %428 = shalt.err (!%p425_p9)
}
  0xb4   :  { %s449_s13 = smov 128   ;;  %s450_s14 = smov 8  }
  0xb5   :  { %363 = dma.vmem_to_hbm [thread:$0]  %s358_s11, 2560, %s580_s1, [#allocation4], %s449_s13, %s449_s13, %s450_s14  }
  0xb6   :  { %439 = dma.done.wait [#allocation4], 2560  }
  0xb7   :  { %440 = vsyncadd [#allocation4], 4294964736 }
  0xb8   :  { %367 = vsyncpa [#allocation3], 1 }
  0xb9   :  { %368 = vsyncpa [#allocation4], 1 }

</bundles_post_ra>
